<compile_context>
chip_gen: v7x
topology: tpu7x:2x2x1
jax: 0.10.0
libtpu: 0.0.40
codegen_flags: <defaults>
</compile_context>

<pallas_src>
import functools
import math

import numpy as np
import jax
import jax.numpy as jnp
from jax.experimental import pallas as pl
from jax.experimental.pallas import tpu as pltpu


# ----------------------------------------------------------------------------
# Irreps bookkeeping (plain Python glue; mirrors check_irreps / irreps_info).
# ----------------------------------------------------------------------------
def irreps_dims(irreps):
    """irreps: sequence of (mul, l). Returns (total_dim, num_instances)."""
    d = sum(mul * (2 * l + 1) for mul, l in irreps)
    k = sum(mul for mul, _ in irreps)
    return d, k


@functools.lru_cache(maxsize=None)
def _segment_matrix_cached(irreps_key, scaled, dtype_name):
    """M[d, k] = (1/(2l+1) if scaled else 1) when component d belongs to
    irrep-instance k, else 0.  Unpadded: shape (D, K)."""
    irreps = list(irreps_key)
    d_tot, k_tot = irreps_dims(irreps)
    m = np.zeros((d_tot, k_tot), dtype=np.float32)
    d_off, k_off = 0, 0
    for mul, l in irreps:
        ir_dim = 2 * l + 1
        w = (1.0 / ir_dim) if scaled else 1.0
        for c in range(mul):
            m[d_off + c * ir_dim: d_off + (c + 1) * ir_dim, k_off + c] = w
        d_off += mul * ir_dim
        k_off += mul
    return jnp.asarray(m, dtype=jnp.dtype(dtype_name))


def build_segment_matrix(irreps, scaled, dtype=jnp.float32):
    key = tuple((int(mul), int(l)) for mul, l in irreps)
    return _segment_matrix_cached(key, bool(scaled), jnp.dtype(dtype).name)


# ----------------------------------------------------------------------------
# Generation-aware VMEM configuration.
# ----------------------------------------------------------------------------
def _vmem_config():
    try:
        cap = int(pltpu.get_tpu_info().vmem_capacity_bytes)
    except Exception:
        cap = 128 * 1024 * 1024  # conservative default: v5e/v6e class
    if cap <= 64 * 1024 * 1024:
        # v7x-class: 64 MiB per TensorCore, 2 TCs/chip -> keep headroom and
        # keep >=2 grid steps so megacore splitting has work for both cores.
        return {"budget": 20 * 1024 * 1024,
                "limit": 32 * 1024 * 1024,
                "multi_core": True}
    # v5e / v6e: 128 MiB VMEM, single TensorCore per chip.
    return {"budget": 48 * 1024 * 1024,
            "limit": 64 * 1024 * 1024,
            "multi_core": False}


# ----------------------------------------------------------------------------
# Tile-size selection with lane/sublane-padded VMEM accounting.
# ----------------------------------------------------------------------------
def _round_up(x, m):
    return -(-x // m) * m


def _choose_tile_n(n, d, k, in_itemsize, out_itemsize, vmem_budget, multi_core):
    # Sublane packing: 8 rows/tile for 32-bit, 16 for bf16, 32 for int8/fp8.
    packing = max(1, 4 // max(1, in_itemsize))
    align = 8 * packing
    if n <= align:
        return n  # single full-extent block for tiny batches

    d_lanes = _round_up(d, 128)
    k_lanes = _round_up(k, 128)
    # Per-row VMEM cost (all buffers lane-padded to 128):
    per_row = (2 * d_lanes * in_itemsize      # double-buffered input tile
               + 2 * d_lanes * 4              # f32 cast + x*x temporaries
               + 2 * k_lanes * out_itemsize   # double-buffered output tile
               + k_lanes * 4)                 # f32 matmul result
    # Constant segment matrix (double-buffered by the pipeline).
    fixed = 2 * _round_up(d, 8) * k_lanes * 4

    avail = max(vmem_budget - fixed, align * per_row)
    t = avail // per_row
    t = min(t, 2048)                          # diminishing returns past ~2k rows
    if multi_core:
        # Keep >= 2 grid steps so both v7x TensorCores receive a block.
        t = min(t, _round_up(-(-n // 2), align))
    t = max(align, (int(t) // align) * align)
    if t >= n:
        return n
    return int(t)


# ----------------------------------------------------------------------------
# Pallas kernel: square -> segment matmul -> (optional) sqrt.
# ----------------------------------------------------------------------------
def _eqt_norm_kernel(x_ref, m_ref, o_ref, *, squared):
    x = x_ref[...].astype(jnp.float32)
    n2 = jnp.dot(x * x, m_ref[...], preferred_element_type=jnp.float32)
    out = n2 if squared else jnp.sqrt(n2)
    o_ref[...] = out.astype(o_ref.dtype)


def eqt_norm(x, irreps, *, scaled, squared, tile_n=None):
    """x: [..., D] with D = irreps dim. Returns [..., K] per-instance norms."""
    d_tot, k_tot = irreps_dims(irreps)
    assert x.shape[-1] == d_tot, f"last dim {x.shape[-1]} != irreps dim {d_tot}"

    batch_shape = x.shape[:-1]
    n = int(math.prod(batch_shape)) if batch_shape else 1
    x2d = x.reshape(n, d_tot)

    cfg = _vmem_config()
    in_itemsize = jnp.dtype(x.dtype).itemsize
    out_itemsize = in_itemsize
    if tile_n is None:
        tile_n = _choose_tile_n(n, d_tot, k_tot, in_itemsize, out_itemsize,
                                cfg["budget"], cfg["multi_core"])
    grid_n = pl.cdiv(n, tile_n)

    m = build_segment_matrix(irreps, scaled)

    kernel = functools.partial(_eqt_norm_kernel, squared=squared)
    out2d = pl.pallas_call(
        kernel,
        out_shape=jax.ShapeDtypeStruct((n, k_tot), x.dtype),
        grid_spec=pltpu.PrefetchScalarGridSpec(
            num_scalar_prefetch=0,
            grid=(grid_n,),
            in_specs=[
                pl.BlockSpec((tile_n, d_tot), lambda i: (i, 0)),
                pl.BlockSpec((d_tot, k_tot), lambda i: (0, 0)),
            ],
            # Unpadded, lane-exact output block: last dim equals the full
            # array dim, so no zero-padding and no wrapper slice/re-write.
            out_specs=pl.BlockSpec((tile_n, k_tot), lambda i: (i, 0)),
        ),
        compiler_params=pltpu.CompilerParams(
            dimension_semantics=("parallel",),
            vmem_limit_bytes=cfg["limit"],
        ),
    )(x2d, m)

    return out2d.reshape(*batch_shape, k_tot)


# ----------------------------------------------------------------------------
# Pure-JAX reference (for sanity check).
# ----------------------------------------------------------------------------
def eqt_norm_ref(x, irreps, *, scaled, squared):
    outs = []
    off = 0
    for mul, l in irreps:
        ir_dim = 2 * l + 1
        seg = x[..., off: off + mul * ir_dim]
        seg = seg.reshape(*x.shape[:-1], mul, ir_dim).astype(jnp.float32)
        n2 = jnp.sum(seg * seg, axis=-1)
        if scaled:
            n2 = n2 / ir_dim
        outs.append(n2 if squared else jnp.sqrt(n2))
        off += mul * ir_dim
    return jnp.concatenate(outs, axis=-1).astype(x.dtype)


if __name__ == "__main__":
    # Example irreps: "4x0e + 3x1o + 2x2e" -> dim = 4 + 9 + 10 = 23, K = 9
    irreps = [(4, 0), (3, 1), (2, 2)]
    d_tot, k_tot = irreps_dims(irreps)

    key = jax.random.PRNGKey(0)
    # Small divisible batch (n = 8) and a ragged batch (n = 21) to exercise
    # the cdiv / masked-last-block path.
    x_small = jax.random.normal(key, (2, 4, d_tot), dtype=jnp.float32)
    x_ragged = jax.random.normal(jax.random.fold_in(key, 1),
                                 (3, 7, d_tot), dtype=jnp.float32)

    ok = True
    for x in (x_small, x_ragged):
        for scaled in (False, True):
            for squared in (False, True):
                out = eqt_norm(x, irreps, scaled=scaled, squared=squared)
                jax.block_until_ready(out)
                ref = eqt_norm_ref(x, irreps, scaled=scaled, squared=squared)
                if out.shape != x.shape[:-1] + (k_tot,):
                    ok = False
                if not jnp.allclose(out, ref, atol=1e-5, rtol=1e-5):
                    ok = False

    if ok:
        print("KERNEL_OK")
</pallas_src>

<mosaic_0001>
module attributes {stable_mosaic.version = 11 : i64} {
  func.func @_eqt_norm_kernel(%arg0: i32, %arg1: memref<8x23xf32, #tpu.memory_space<vmem>>, %arg2: memref<23x9xf32, #tpu.memory_space<vmem>>, %arg3: memref<8x9xf32, #tpu.memory_space<vmem>>) attributes {dimension_semantics = [#tpu.dimension_semantics<parallel>], iteration_bounds = array<i64: 1>, scalar_prefetch = 0 : i64, scratch_operands = 0 : i64, tpu.core_type = #tpu.core_type<tc>, window_params = [{transform_indices = @transform_0, window_bounds = array<i64: 8, 23>}, {pipeline_mode = #tpu.pipeline_mode<synchronous>, transform_indices = @transform_1, window_bounds = array<i64: 23, 9>}, {transform_indices = @transform_2, window_bounds = array<i64: 8, 9>}]} {
    %c0 = arith.constant 0 : index
    %c0_0 = arith.constant 0 : index
    %0 = vector.load %arg1[%c0, %c0_0] : memref<8x23xf32, #tpu.memory_space<vmem>>, vector<8x23xf32>
    %1 = arith.mulf %0, %0 : vector<8x23xf32>
    %c0_1 = arith.constant 0 : index
    %c0_2 = arith.constant 0 : index
    %2 = vector.load %arg2[%c0_1, %c0_2] : memref<23x9xf32, #tpu.memory_space<vmem>>, vector<23x9xf32>
    %cst = arith.constant dense<0.000000e+00> : vector<8x9xf32>
    %3 = tpu.matmul %1, %2, %cst {dimension_numbers = #tpu.dot_dimension_numbers<[1], [0], [0], [1], [0, 0, 1, 1], [], []>} : vector<8x23xf32>, vector<23x9xf32>, vector<8x9xf32> -> vector<8x9xf32>
    %4 = math.sqrt %3 : vector<8x9xf32>
    %c0_3 = arith.constant 0 : index
    %c0_4 = arith.constant 0 : index
    %5 = vector.load %arg3[%c0_3, %c0_4] : memref<8x9xf32, #tpu.memory_space<vmem>>, vector<8x9xf32>
    tpu.vector_store %arg3[%c0_3, %c0_4], %4 {strides = array<i32>} : memref<8x9xf32, #tpu.memory_space<vmem>>, vector<8x9xf32>,
    return
  }
  func.func @transform_0(%arg0: i32) -> (i32, i32) {
    %c0_i32 = arith.constant 0 : i32
    %c0_i32_0 = arith.constant 0 : i32
    return %arg0, %c0_i32 : i32, i32
  }
  func.func @transform_1(%arg0: i32) -> (i32, i32) {
    %c0_i32 = arith.constant 0 : i32
    %c0_i32_0 = arith.constant 0 : i32
    %c0_i32_1 = arith.constant 0 : i32
    return %c0_i32, %c0_i32_0 : i32, i32
  }
  func.func @transform_2(%arg0: i32) -> (i32, i32) {
    %c0_i32 = arith.constant 0 : i32
    %c0_i32_0 = arith.constant 0 : i32
    return %arg0, %c0_i32 : i32, i32
  }
}

</mosaic_0001>

<bundles_post_ra>
// kernel: tpu_custom_call.1
= control target key start
LH: loop header
LB: loop body
LE: loop exit
PB: predicated region body
PF: predicated region fallthrough
CT: control target
= control target key end

     0   :  { %7 = vsyncpa [#allocation3], 0  ;;  %s312_s0 = inlined_call_operand.hbm [shape: f32[8,23], index: 0, kind: input, shape index: {}]   ;;  %s313_s1 = inlined_call_operand.hbm [shape: f32[23,9], index: 1, kind: input, shape index: {}]   ;;  %s314_s2 = inlined_call_operand.hbm [shape: f32[8,9], index: 2, kind: output, shape index: {}]  }
   0x1   :  { %8 = vsyncpa [#allocation6], 0 }
   0x2   :  { %9 = vsyncpa [#allocation4], 0  ;;  %s246_s9 = smov [#allocation2]   ;;  %s247_s11 = smov [#allocation5]  }
   0x3   :  { %s16_s10 = sshll.u32 %s246_s9, 4  ;;  %s25_s12 = sshll.u32 %s247_s11, 4  ;;  %s17_s10 = int_to_ptr.vmem [resolvable:$true] %s16_s10  ;;  %s269_s12 = int_to_ptr.vmem [resolvable:$true] %s25_s12 }
   0x4   :  { %s174_s15 = scalar_lea.hbm %s312_s0, 128 }
   0x5   :  { %p175_p0 = scmp.ne.s32.totalorder %s312_s0, %s174_s15  ;;  %p178_p1 = scmp.lt.u32.totalorder %s174_s15, %s312_s0 }
   0x7   :  { %p180_p2 = pnand %p178_p1, %p175_p0 }
   0x9   :  { %183 = shalt.err (!%p180_p2)
}
   0xa   :  { %s184_s20 = scalar_lea.vmem %s17_s10, 128  ;;  %p189_p4 = scmp.lt.s32.totalorder %s17_s10, %s17_s10 }
   0xb   :  { %p185_p3 = scmp.ne.s32.totalorder %s17_s10, %s184_s20  ;;  %p190_p5 = scmp.lt.s32.totalorder %s184_s20, %s184_s20 }
   0xd   :  { %p191_p6 = por %p190_p5, %p189_p4 }
   0xf   :  { %p192_p7 = pnand %p191_p6, %p185_p3 }
  0x11   :  { %195 = shalt.err (!%p192_p7)
}
  0x12   :  { %19 = dma.hbm_to_vmem [thread:$0]  %s312_s0, 128, %s17_s10, [#allocation3]  }
  0x13   :  { %s196_s25 = scalar_lea.hbm %s313_s1, 384 }
  0x14   :  { %p197_p8 = scmp.ne.s32.totalorder %s313_s1, %s196_s25  ;;  %p200_p9 = scmp.lt.u32.totalorder %s196_s25, %s313_s1 }
  0x16   :  { %p202_p10 = pnand %p200_p9, %p197_p8 }
  0x18   :  { %205 = shalt.err (!%p202_p10)
}
  0x19   :  { %s206_s30 = scalar_lea.vmem %s269_s12, 384  ;;  %p211_p12 = scmp.lt.s32.totalorder %s269_s12, %s269_s12 }
  0x1a   :  { %p207_p11 = scmp.ne.s32.totalorder %s269_s12, %s206_s30  ;;  %p212_p13 = scmp.lt.s32.totalorder %s206_s30, %s206_s30 }
  0x1c   :  { %p213_p0 = por %p212_p13, %p211_p12 }
  0x1e   :  { %p214_p1 = pnand %p213_p0, %p207_p11 }
  0x20   :  { %217 = shalt.err (!%p214_p1)
}
  0x21   :  { %s248_s0 = smov 128   ;;  %s249_s3 = smov 8  }
  0x22   :  { %31 = dma.hbm_to_vmem [thread:$0]  %s313_s1, 384, %s269_s12, [#allocation6], %s248_s0, %s248_s0, %s249_s3  }
  0x23   :  { %240 = dma.done.wait [#allocation3], 128  }
  0x24   :  { %241 = vsyncadd [#allocation3], 4294967168 }
  0x25   :  { %242 = dma.done.wait [#allocation6], 384  }
  0x26   :  { %243 = vsyncadd [#allocation6], 4294966912  ;;  %v250_v0 = vmov 0.0|0.0   ;;  %vm251_vm0 = vmmov 0   ;;  %v252_v1 = vmov 0.0   ;;  %v40_v2 = vld [vmem:[#allocation5] sm:$0xff] }
  0x27   :  { %161 = vmatprep.subr.bf16.mxu0 %v250_v0  ;;  %158 = vmatprep.mubr.msk.f32.mxu0 %vm251_vm0, %v252_v1  ;;  %v41_v3 = vld [vmem:[#allocation5 + $0x8] sm:$0xff]  ;;  %v38_v5 = vld [vmem:[#allocation2] sm:$0xff]  ;;  %v42_v6 = vld [vmem:[#allocation5 + $0x10] sm:$0x7f]  ;;  %vm47_vm1 = vcmask 1046528   ;;  %vm43_vm2 = vcmask 187392  }
  0x28   :  { %v162_v4 = vpack.c.bf16 %v41_v3, %v40_v2  ;;  %v39_v7 = vmul.f32 %v38_v5, %v38_v5  ;;  %s253_s1 = smov [#allocation7]   ;;  %vm128_vm4 = vcmask 72704  }
  0x29   :  { %s136_s6 = sshll.u32 %s253_s1, 4  ;;  %s137_s6 = int_to_ptr.vmem [resolvable:$true] %s136_s6 }
  0x2a   :  { %163 = vmatpush3.bf16.msra.mxu0 %v162_v4  ;;  %s218_s7 = scalar_lea.vmem %s137_s6, 128  ;;  %p223_p3 = scmp.lt.s32.totalorder %s137_s6, %s137_s6 }
  0x2b   :  { %156 = vmatprep.subr.mxu0 %v252_v1  ;;  %p219_p2 = scmp.ne.s32.totalorder %s137_s6, %s218_s7  ;;  %p224_p4 = scmp.lt.s32.totalorder %s218_s7, %s218_s7 }
  0x2d   :  { %p225_p5 = por %p224_p4, %p223_p3 }
  0x2e   :  { %157 = vmatpush3.msk.msra.mxu0 %vm47_vm1, %v42_v6 }
  0x2f   :  { %159 = vmatmul.mubr.msk.f32.vlgmr.msra.gmra.mrb[0].mxu0 %vm43_vm2, %v39_v7  ;;  %p226_p6 = pnand %p225_p5, %p219_p2 }
 0x102   :  { %v117_v8 = vpop.f32.mrb[0].mxu0 }
 0x103   :  { %172 = vrsqrt.f32 %v117_v8  ;;  %v160_v9 = vpop.f32.mrb[1].mxu0  ;;  %vm123_vm3 = vcmp.eq.f32.partialorder %v117_v8, inf  ;;  %v126_v12 = vand.u32 2147483648, %v117_v8  ;;  %vm125_vm5 = vcmp.eq.f32.partialorder %v117_v8, 0.0 }
 0x10d   :  { %v173_v10 = vpop.eup %172 }
 0x10e   :  { %v122_v11 = vmul.f32 %v173_v10, %v117_v8 }
 0x110   :  { %v124_v13 = vsel %vm123_vm3, %v117_v8, %v122_v11 }
 0x111   :  { %v127_v14 = vsel %vm125_vm5, %v126_v12, %v124_v13 }
 0x112   :  { %129 = vst.msk [vmem:[#allocation7] sm:$0xff] %vm128_vm4, %v127_v14 }
 0x113   :  { %229 = shalt.err (!%p226_p6)
}
 0x114   :  { %s230_s10 = scalar_lea.hbm %s314_s2, 128 }
 0x115   :  { %p231_p7 = scmp.ne.s32.totalorder %s314_s2, %s230_s10  ;;  %p234_p8 = scmp.lt.u32.totalorder %s230_s10, %s314_s2 }
 0x117   :  { %p236_p9 = pnand %p234_p8, %p231_p7 }
 0x119   :  { %239 = shalt.err (!%p236_p9)
}
 0x11a   :  { %139 = dma.vmem_to_hbm [thread:$0]  %s137_s6, 128, %s314_s2, [#allocation4]  }
 0x11b   :  { %244 = dma.done.wait [#allocation4], 128  }
 0x11c   :  { %245 = vsyncadd [#allocation4], 4294967168 }
 0x11d   :  { %143 = vsyncpa [#allocation3], 1 }
 0x11e   :  { %144 = vsyncpa [#allocation6], 1 }
 0x11f   :  { %145 = vsyncpa [#allocation4], 1 }

</bundles_post_ra>
